<compile_context>
chip_gen: v7x
topology: tpu7x:2x2x1
jax: 0.10.0
libtpu: 0.0.40
codegen_flags: <defaults>
</compile_context>

<pallas_src>
import functools

import numpy as np
import jax
import jax.numpy as jnp
from jax.experimental import pallas as pl
from jax.experimental.pallas import tpu as pltpu  # noqa: F401  (TPU backend)

# ----------------------------- model dims -----------------------------------
B, C, H, W = 2, 4, 16, 16        # input images (NCHW)
C_MID = 8                        # per-branch hidden channels
C_P = 4                          # out_p channels
C_BC = 2                         # out_bc channels
ONES_ROWS = 8                    # sublane-aligned block of constant-1 rows


# ------------------------------- kernel --------------------------------------
def _fused_kernel(x647_ref, x750_ref, w1_ref, w2_ref, out_ref):
    # x647_ref / x750_ref: (B*C, HW)            pixels on lanes (lane-dense)
    # w1_ref:              (N_H_PAD, 2*B*C + 8) batch/branch block-diag + bias col
    # w2_ref:              (N_OUT_PAD, N_H_PAD) both heads + bias col
    # out_ref:             (N_OUT_PAD, HW)      out_p rows, out_bc rows, padding
    hw = x647_ref.shape[1]
    x_aug = jnp.concatenate(
        [x647_ref[...], x750_ref[...], jnp.ones((ONES_ROWS, hw), jnp.float32)],
        axis=0)                                               # (2*B*C+8, HW)
    h = jnp.maximum(
        jnp.dot(w1_ref[...], x_aug, preferred_element_type=jnp.float32), 0.0)
    out_ref[...] = jnp.dot(
        w2_ref[...], h, preferred_element_type=jnp.float32).astype(out_ref.dtype)


# ------------------------- one-time weight packing ----------------------------
def prepare_params(params, batch=B):
    """Pack the per-branch / per-head weights+biases into two matrices.

    Runs ONCE (host-side numpy) -- not on the per-call path.
    Returns (w1, w2, c_p, c_bc).
    """
    w647, b647, w750, b750, wp, bp, wbc, bbc = [np.asarray(p) for p in params]
    c, c_mid = w647.shape
    c_p = int(wp.shape[1])
    c_bc = int(wbc.shape[1])

    k_in = 2 * batch * c + ONES_ROWS           # input rows + constant-1 rows
    n_h = 2 * batch * c_mid + 1                # hidden rows + constant-1 row
    n_h_pad = -(-n_h // 8) * 8                 # 40
    n_out = batch * (c_p + c_bc)               # 12
    n_out_pad = -(-n_out // 8) * 8             # 16

    ones_col = 2 * batch * c                   # first constant-1 input row (16)
    const_row = 2 * batch * c_mid              # constant-1 hidden row (32)

    w1 = np.zeros((n_h_pad, k_in), np.float32)
    w2 = np.zeros((n_out_pad, n_h_pad), np.float32)

    for b in range(batch):
        r0 = b * c_mid                         # h rows of branch 647, batch b
        r1 = batch * c_mid + b * c_mid         # h rows of branch 750, batch b
        # branch 1x1 convs (as W @ X) + biases folded into the ones column
        w1[r0:r0 + c_mid, b * c:(b + 1) * c] = w647.T
        w1[r0:r0 + c_mid, ones_col] = b647.ravel()
        w1[r1:r1 + c_mid, batch * c + b * c:batch * c + (b + 1) * c] = w750.T
        w1[r1:r1 + c_mid, ones_col] = b750.ravel()
        # head out_p (rows 0 .. batch*c_p-1)
        for p in range(c_p):
            r = b * c_p + p
            w2[r, r0:r0 + c_mid] = wp[:c_mid, p]
            w2[r, r1:r1 + c_mid] = wp[c_mid:, p]
            w2[r, const_row] = bp.ravel()[p]
        # head out_bc (rows batch*c_p .. batch*c_p + batch*c_bc - 1)
        for q in range(c_bc):
            r = batch * c_p + b * c_bc + q
            w2[r, r0:r0 + c_mid] = wbc[:c_mid, q]
            w2[r, r1:r1 + c_mid] = wbc[c_mid:, q]
            w2[r, const_row] = bbc.ravel()[q]

    # constant-1 hidden row: zero weights, bias 1.0 (> 0, survives the ReLU)
    w1[const_row, ones_col] = 1.0

    return jnp.asarray(w1), jnp.asarray(w2), c_p, c_bc


# ------------------------------- forward --------------------------------------
@functools.partial(jax.jit, static_argnames=("c_p", "c_bc"))
def robofish_quant_forward(x647, x750, w1, w2, *, c_p, c_bc):
    """x647, x750: (B, C, H, W) float32 (NCHW).  Returns (out_p, out_bc) NCHW."""
    b, c, hgt, wdt = x647.shape
    hw = hgt * wdt

    # QuantStub / DeQuantStub are identities in fp32 eval mode.
    # NCHW -> (B*C, HW) is a contiguous reshape: no transpose, no copy.
    out = pl.pallas_call(
        _fused_kernel,
        # No grid: whole problem (~20 KB) runs in a single step with default
        # full-array VMEM blocks; one (8,128)-aligned output slab.
        out_shape=jax.ShapeDtypeStruct((w2.shape[0], hw), jnp.float32),
    )(x647.reshape(b * c, hw), x750.reshape(b * c, hw), w1, w2)

    n_p = b * c_p
    out_p = out[:n_p].reshape(b, c_p, hgt, wdt)                 # rows 0..n_p-1
    out_bc = out[n_p:n_p + b * c_bc].reshape(b, c_bc, hgt, wdt)  # next rows
    return out_p, out_bc


# --------------------------- synthetic params ---------------------------------
def make_params(key):
    """Deterministic synthetic weights for the wrapped `main` model."""
    ks = jax.random.split(key, 8)
    scale = 0.1
    w647 = scale * jax.random.normal(ks[0], (C, C_MID), jnp.float32)
    b647 = scale * jax.random.normal(ks[1], (1, C_MID), jnp.float32)
    w750 = scale * jax.random.normal(ks[2], (C, C_MID), jnp.float32)
    b750 = scale * jax.random.normal(ks[3], (1, C_MID), jnp.float32)
    wp = scale * jax.random.normal(ks[4], (2 * C_MID, C_P), jnp.float32)
    bp = scale * jax.random.normal(ks[5], (1, C_P), jnp.float32)
    wbc = scale * jax.random.normal(ks[6], (2 * C_MID, C_BC), jnp.float32)
    bbc = scale * jax.random.normal(ks[7], (1, C_BC), jnp.float32)
    return (w647, b647, w750, b750, wp, bp, wbc, bbc)


def _reference(x647, x750, params):
    """Pure-JAX (non-Pallas) reference of the same two-branch model."""
    w647, b647, w750, b750, wp, bp, wbc, bbc = params
    b, c, hgt, wdt = x647.shape
    n = b * hgt * wdt

    def rows(x):
        return jnp.transpose(x, (0, 2, 3, 1)).reshape(n, c)

    h = jnp.concatenate(
        [jnp.maximum(rows(x647) @ w647 + b647, 0.0),
         jnp.maximum(rows(x750) @ w750 + b750, 0.0)], axis=-1)
    op = h @ wp + bp
    ob = h @ wbc + bbc

    def nchw(x, co):
        return jnp.transpose(x.reshape(b, hgt, wdt, co), (0, 3, 1, 2))

    return nchw(op, wp.shape[1]), nchw(ob, wbc.shape[1])


if __name__ == "__main__":
    key = jax.random.PRNGKey(0)
    k_x647, k_x750, k_params = jax.random.split(key, 3)

    # NCHW inputs, matching the PyTorch convention
    x647 = jax.random.normal(k_x647, (B, C, H, W), jnp.float32)
    x750 = jax.random.normal(k_x750, (B, C, H, W), jnp.float32)
    params = make_params(k_params)

    # TODO(synk): the wrapped `main` model is a constructor argument in the
    # PyTorch source and is not defined there; a representative two-branch
    # 1x1-conv model is used here.

    # One-time packing, hoisted off the per-call path.
    w1, w2, c_p, c_bc = prepare_params(params)

    out_p, out_bc = robofish_quant_forward(x647, x750, w1, w2,
                                           c_p=c_p, c_bc=c_bc)
    jax.block_until_ready((out_p, out_bc))

    assert out_p.shape == (B, C_P, H, W)
    assert out_bc.shape == (B, C_BC, H, W)

    # Numerical check against a pure-JAX reference (generous tol: MXU matmul
    # passes vs. XLA default precision).
    ref_p, ref_bc = _reference(x647, x750, params)
    assert jnp.allclose(out_p, ref_p, rtol=1e-2, atol=1e-3)
    assert jnp.allclose(out_bc, ref_bc, rtol=1e-2, atol=1e-3)

    print("KERNEL_OK")
</pallas_src>

<mosaic_0001>
module attributes {stable_mosaic.version = 11 : i64} {
  func.func @_fused_kernel(%arg0: memref<8x256xf32, #tpu.memory_space<vmem>>, %arg1: memref<8x256xf32, #tpu.memory_space<vmem>>, %arg2: memref<40x24xf32, #tpu.memory_space<vmem>>, %arg3: memref<16x40xf32, #tpu.memory_space<vmem>>, %arg4: memref<16x256xf32, #tpu.memory_space<vmem>>) attributes {dimension_semantics = [], scalar_prefetch = 0 : i64, scratch_operands = 0 : i64, tpu.core_type = #tpu.core_type<tc>} {
    %c0 = arith.constant 0 : index
    %c0_0 = arith.constant 0 : index
    %0 = vector.load %arg0[%c0, %c0_0] : memref<8x256xf32, #tpu.memory_space<vmem>>, vector<8x256xf32>
    %c0_1 = arith.constant 0 : index
    %c0_2 = arith.constant 0 : index
    %1 = vector.load %arg1[%c0_1, %c0_2] : memref<8x256xf32, #tpu.memory_space<vmem>>, vector<8x256xf32>
    %cst = arith.constant 1.000000e+00 : f32
    %2 = vector.broadcast %cst : f32 to vector<8x256xf32>
    %3 = tpu.concatenate %0, %1, %2 in 0 : vector<8x256xf32>, vector<8x256xf32>, vector<8x256xf32> -> vector<24x256xf32>
    %c0_3 = arith.constant 0 : index
    %c0_4 = arith.constant 0 : index
    %4 = vector.load %arg2[%c0_3, %c0_4] : memref<40x24xf32, #tpu.memory_space<vmem>>, vector<40x24xf32>
    %cst_5 = arith.constant dense<0.000000e+00> : vector<40x256xf32>
    %5 = tpu.matmul %4, %3, %cst_5 {dimension_numbers = #tpu.dot_dimension_numbers<[1], [0], [0], [1], [0, 0, 1, 1], [], []>} : vector<40x24xf32>, vector<24x256xf32>, vector<40x256xf32> -> vector<40x256xf32>
    %cst_6 = arith.constant 0.000000e+00 : f32
    %6 = vector.broadcast %cst_6 : f32 to vector<40x256xf32>
    %7 = arith.maximumf %5, %6 : vector<40x256xf32>
    %c0_7 = arith.constant 0 : index
    %c0_8 = arith.constant 0 : index
    %8 = vector.load %arg3[%c0_7, %c0_8] : memref<16x40xf32, #tpu.memory_space<vmem>>, vector<16x40xf32>
    %cst_9 = arith.constant dense<0.000000e+00> : vector<16x256xf32>
    %9 = tpu.matmul %8, %7, %cst_9 {dimension_numbers = #tpu.dot_dimension_numbers<[1], [0], [0], [1], [0, 0, 1, 1], [], []>} : vector<16x40xf32>, vector<40x256xf32>, vector<16x256xf32> -> vector<16x256xf32>
    %c0_10 = arith.constant 0 : index
    %c0_11 = arith.constant 0 : index
    %10 = vector.load %arg4[%c0_10, %c0_11] : memref<16x256xf32, #tpu.memory_space<vmem>>, vector<16x256xf32>
    tpu.vector_store %arg4[%c0_10, %c0_11], %9 {strides = array<i32>} : memref<16x256xf32, #tpu.memory_space<vmem>>, vector<16x256xf32>,
    return
  }
}

</mosaic_0001>

<bundles_post_ra>
// kernel: robofish_quant_forward.1
= control target key start
LH: loop header
LB: loop body
LE: loop exit
PB: predicated region body
PF: predicated region fallthrough
CT: control target
= control target key end

     0   :  { %v262_v3 = vmov 0.0   ;;  %v263_v7 = vmov 1.0   ;;  %vm26_vm0 = vcmask 195584   ;;  %vm149_vm1 = vcmask 326656   ;;  %s334_s0 = inlined_call_operand.vmem [shape: f32[8,256], index: 0, kind: input, shape index: {}]   ;;  %s335_s1 = inlined_call_operand.vmem [shape: f32[8,256], index: 1, kind: input, shape index: {}]   ;;  %s336_s2 = inlined_call_operand.vmem [shape: f32[40,24], index: 2, kind: input, shape index: {}]   ;;  %s337_s3 = inlined_call_operand.vmem [shape: f32[16,40], index: 3, kind: input, shape index: {}]   ;;  %s338_s4 = inlined_call_operand.vmem [shape: f32[16,256], index: 4, kind: output, shape index: {}]  }
   0x1   :  { %v18_v0 = vld [vmem:[%s334_s0 + $0x8] sm:$0xff]  ;;  %v17_v2 = vld [vmem:[%s334_s0] sm:$0xff]  ;;  %106 = vmatprep.mubr.f32.mxu0 %v262_v3  ;;  %220 = vmatprep.mubr.f32.mxu1 %v262_v3  ;;  %v23_v10 = vld [vmem:[%s336_s2 + $0x10] sm:$0xff] }
   0x2   :  { %v20_v1 = vld [vmem:[%s335_s1 + $0x8] sm:$0xff]  ;;  %v19_v5 = vld [vmem:[%s335_s1] sm:$0xff]  ;;  %v24_v11 = vld [vmem:[%s336_s2 + $0x18] sm:$0xff] }
   0x3   :  { %v248_v4 = vpack.c.bf16 %v20_v1, %v18_v0  ;;  %v250_v6 = vpack.c.bf16 %v19_v5, %v17_v2  ;;  %v21_v8 = vld [vmem:[%s336_s2] sm:$0xff]  ;;  %v22_v9 = vld [vmem:[%s336_s2 + $0x8] sm:$0xff] }
   0x4   :  { %v25_v12 = vld [vmem:[%s336_s2 + $0x20] sm:$0xff]  ;;  %v148_v38 = vld [vmem:[%s337_s3 + $0x8] sm:$0xff] }
   0x5   :  { %249 = vmatprep.subr.bf16.mxu0 %v248_v4  ;;  %v147_v37 = vld [vmem:[%s337_s3] sm:$0xff] }
   0x6   :  { %251 = vmatpush1.bf16.msra.mxu0 %v250_v6 }
   0x7   :  { %46 = vmatprep.subr.mxu0 %v263_v7 }
   0xa   :  { %47 = vmatpush1.msra.mxu0 %v263_v7 }
   0xb   :  { %241 = vmatmul.mubr.msk.f32.vlgmr.msra.gmra.mrb[0].mxu0 %vm26_vm0, %v21_v8 }
   0xc   :  { %112 = vmatprep.mubr.f32.mxu0 %v262_v3 }
   0xf   :  { %242 = vmatmul.mubr.msk.f32.gmra.mrb[2].mxu0 %vm26_vm0, %v22_v9 }
  0x10   :  { %118 = vmatprep.mubr.f32.mxu0 %v262_v3 }
  0x13   :  { %243 = vmatmul.mubr.msk.f32.gmra.mrb[4].mxu0 %vm26_vm0, %v23_v10 }
  0x14   :  { %124 = vmatprep.mubr.f32.mxu0 %v262_v3 }
  0x17   :  { %244 = vmatmul.mubr.msk.f32.gmra.mrb[6].mxu0 %vm26_vm0, %v24_v11 }
  0x18   :  { %130 = vmatprep.mubr.f32.mxu0 %v262_v3 }
  0x1b   :  { %245 = vmatmul.mubr.msk.f32.gmra.mrb[8].mxu0 %vm26_vm0, %v25_v12 }
  0xde   :  { %v108_v13 = vpop.f32.mrb[0].mxu0 }
  0xdf   :  { %v110_v14 = vpop.f32.mrb[1].mxu0  ;;  %v137_v16 = vmax.f32 %v108_v13, 0.0 }
  0xe0   :  { %v138_v19 = vmax.f32 %v110_v14, 0.0 }
  0xe2   :  { %v114_v15 = vpop.f32.mrb[2].mxu0 }
  0xe3   :  { %v139_v17 = vmax.f32 %v114_v15, 0.0  ;;  %v116_v18 = vpop.f32.mrb[3].mxu0 }
  0xe4   :  { %v140_v20 = vmax.f32 %v116_v18, 0.0 }
  0xe5   :  { %v254_v21 = vpack.c.bf16 %v139_v17, %v137_v16 }
  0xe6   :  { %v120_v22 = vpop.f32.mrb[4].mxu0  ;;  %v252_v23 = vpack.c.bf16 %v140_v20, %v138_v19 }
  0xe7   :  { %v122_v24 = vpop.f32.mrb[5].mxu0  ;;  %v141_v26 = vmax.f32 %v120_v22, 0.0 }
  0xe8   :  { %253 = vmatprep.subr.bf16.mxu1 %v252_v23  ;;  %v142_v29 = vmax.f32 %v122_v24, 0.0 }
  0xe9   :  { %255 = vmatpush1.bf16.msra.mxu1 %v254_v21 }
  0xea   :  { %v126_v25 = vpop.f32.mrb[6].mxu0 }
  0xeb   :  { %v143_v27 = vmax.f32 %v126_v25, 0.0  ;;  %v128_v28 = vpop.f32.mrb[7].mxu0 }
  0xec   :  { %v144_v30 = vmax.f32 %v128_v28, 0.0 }
  0xed   :  { %v258_v31 = vpack.c.bf16 %v143_v27, %v141_v26 }
  0xee   :  { %v256_v32 = vpack.c.bf16 %v144_v30, %v142_v29  ;;  %v132_v33 = vpop.f32.mrb[8].mxu0 }
  0xef   :  { %v134_v34 = vpop.f32.mrb[9].mxu0  ;;  %v145_v36 = vmax.f32 %v132_v33, 0.0 }
  0xf0   :  { %v146_v35 = vmax.f32 %v134_v34, 0.0  ;;  %257 = vmatprep.subr.bf16.mxu1 %v256_v32 }
  0xf1   :  { %259 = vmatpush1.bf16.msra.mxu1 %v258_v31 }
  0xf2   :  { %164 = vmatprep.subr.mxu1 %v146_v35 }
  0xf5   :  { %165 = vmatpush1.msra.mxu1 %v145_v36 }
  0xf6   :  { %246 = vmatmul.mubr.msk.f32.vlgmr.msra.gmra.mrb[0].mxu1 %vm149_vm1, %v147_v37 }
  0xf7   :  { %226 = vmatprep.mubr.f32.mxu1 %v262_v3 }
  0xfa   :  { %247 = vmatmul.mubr.msk.f32.gmra.mrb[2].mxu1 %vm149_vm1, %v148_v38 }
 0x1c9   :  { %v222_v39 = vpop.f32.mrb[0].mxu1 }
 0x1ca   :  { %233 = vst [vmem:[%s338_s4] sm:$0xff] %v222_v39  ;;  %v224_v40 = vpop.f32.mrb[1].mxu1 }
 0x1cb   :  { %234 = vst [vmem:[%s338_s4 + $0x8] sm:$0xff] %v224_v40 }
 0x1cd   :  { %v228_v41 = vpop.f32.mrb[2].mxu1 }
 0x1ce   :  { %235 = vst [vmem:[%s338_s4 + $0x10] sm:$0xff] %v228_v41  ;;  %v230_v42 = vpop.f32.mrb[3].mxu1 }
 0x1cf   :  { %236 = vst [vmem:[%s338_s4 + $0x18] sm:$0xff] %v230_v42 }

</bundles_post_ra>
